<compile_context>
chip_gen: v6e
topology: v6e:2x2x1
jax: 0.10.0
libtpu: 0.0.40
codegen_flags: <defaults>
</compile_context>

<pallas_src>
import functools

import jax
import jax.numpy as jnp
from jax.experimental import pallas as pl
from jax.experimental.pallas import tpu as pltpu


# ---------------------------------------------------------------------------
# Helpers
# ---------------------------------------------------------------------------

@functools.lru_cache(maxsize=None)
def _vmem_limit_bytes():
    """Generation-aware VMEM budget (~3/4 of per-core VMEM, capped)."""
    try:
        cap = int(pltpu.get_tpu_info().vmem_capacity_bytes)
    except Exception:
        cap = 64 * 1024 * 1024  # conservative (v7x-sized) fallback
    return max(32 * 1024 * 1024, min(3 * cap // 4, 96 * 1024 * 1024))


def _pick_tile(dim, target, align):
    """Largest divisor of `dim` <= target, preferring multiples of `align`.

    Returns the full dim when it already fits `target`. Falls back to the
    largest (possibly unaligned) divisor for awkward sizes; truly prime-like
    dims would need padded/masked tails (not required for these shapes).
    """
    if dim <= target:
        return dim
    fallback = dim
    for t in range(target, 0, -1):
        if dim % t == 0:
            if t % align == 0:
                return t
            if fallback == dim:
                fallback = t
    return fallback


# ---------------------------------------------------------------------------
# Fused QKV projection: reads x once, one [K, 3N] bf16 weight, produces q,k,v.
# ---------------------------------------------------------------------------

def _qkv_proj_kernel_acc(x_ref, w_ref, b_ref, q_ref, k_ref, v_ref, acc_ref, *, n):
    kk = pl.program_id(1)

    @pl.when(kk == 0)
    def _():
        acc_ref[...] = jnp.zeros(acc_ref.shape, jnp.float32)

    x = x_ref[...].astype(jnp.bfloat16)  # bf16 MXU operand, f32 accumulate
    acc_ref[...] += jnp.dot(x, w_ref[...], preferred_element_type=jnp.float32)

    @pl.when(kk == pl.num_programs(1) - 1)
    def _():
        out = acc_ref[...] + b_ref[...]
        q_ref[...] = out[:, 0 * n:1 * n].astype(q_ref.dtype)
        k_ref[...] = out[:, 1 * n:2 * n].astype(k_ref.dtype)
        v_ref[...] = out[:, 2 * n:3 * n].astype(v_ref.dtype)


def _qkv_proj_kernel_direct(x_ref, w_ref, b_ref, q_ref, k_ref, v_ref, *, n):
    # Single-K-step fast path: no scratch, no init/finalize, resident weight.
    x = x_ref[...].astype(jnp.bfloat16)
    out = jnp.dot(x, w_ref[...], preferred_element_type=jnp.float32) + b_ref[...]
    q_ref[...] = out[:, 0 * n:1 * n].astype(q_ref.dtype)
    k_ref[...] = out[:, 1 * n:2 * n].astype(k_ref.dtype)
    v_ref[...] = out[:, 2 * n:3 * n].astype(v_ref.dtype)


def qkv_projection(x, w_qkv, b_qkv, *, tm_target=256, tk_target=256,
                   out_dtype=jnp.bfloat16):
    """x: [M, K]; w_qkv: [K, 3N]; b_qkv: [3N] -> (q, k, v) each [M, N] bf16."""
    M, K = x.shape
    N3 = w_qkv.shape[1]
    N = N3 // 3
    w_qkv = w_qkv.astype(jnp.bfloat16)
    b_qkv = b_qkv.astype(jnp.float32).reshape(1, N3)

    tm = _pick_tile(M, tm_target, 8)
    tk = _pick_tile(K, tk_target, 128)
    nk = K // tk
    grid = (M // tm, nk)

    x_spec = pl.BlockSpec((tm, tk), lambda i, kk: (i, kk))
    w_spec = pl.BlockSpec((tk, N3), lambda i, kk: (kk, 0))
    b_spec = pl.BlockSpec((1, N3), lambda i, kk: (0, 0))
    o_spec = pl.BlockSpec((tm, N), lambda i, kk: (i, 0))
    out_sds = jax.ShapeDtypeStruct((M, N), out_dtype)

    if nk == 1:
        kern = functools.partial(_qkv_proj_kernel_direct, n=N)
        scratch = []
    else:
        kern = functools.partial(_qkv_proj_kernel_acc, n=N)
        scratch = [pltpu.VMEM((tm, N3), jnp.float32)]

    x_b = jnp.dtype(x.dtype).itemsize
    o_b = jnp.dtype(out_dtype).itemsize
    return pl.pallas_call(
        kern,
        out_shape=(out_sds, out_sds, out_sds),
        grid=grid,
        in_specs=[x_spec, w_spec, b_spec],
        out_specs=(o_spec, o_spec, o_spec),
        scratch_shapes=scratch,
        compiler_params=pltpu.CompilerParams(
            dimension_semantics=("parallel", "arbitrary"),
            vmem_limit_bytes=_vmem_limit_bytes()),
        cost_estimate=pl.CostEstimate(
            flops=2 * M * K * N3,
            transcendentals=0,
            bytes_accessed=x_b * M * K + 2 * K * N3 * (M // tm)
                           + o_b * 3 * M * N + 4 * N3),
    )(x, w_qkv, b_qkv)


# ---------------------------------------------------------------------------
# Tiled linear (out-projection): grid (M, N, K), bf16 MXU ops, f32 accumulate.
# ---------------------------------------------------------------------------

def _linear_kernel_acc(x_ref, w_ref, b_ref, o_ref, acc_ref):
    kk = pl.program_id(2)

    @pl.when(kk == 0)
    def _():
        acc_ref[...] = jnp.zeros(acc_ref.shape, jnp.float32)

    acc_ref[...] += jnp.dot(x_ref[...].astype(jnp.bfloat16), w_ref[...],
                            preferred_element_type=jnp.float32)

    @pl.when(kk == pl.num_programs(2) - 1)
    def _():
        o_ref[...] = (acc_ref[...] + b_ref[...]).astype(o_ref.dtype)


def _linear_kernel_direct(x_ref, w_ref, b_ref, o_ref):
    acc = jnp.dot(x_ref[...].astype(jnp.bfloat16), w_ref[...],
                  preferred_element_type=jnp.float32)
    o_ref[...] = (acc + b_ref[...]).astype(o_ref.dtype)


def linear(x, w, b, *, out_dtype=None, tm_target=256, tn_target=256,
           tk_target=256):
    M, K = x.shape
    N = w.shape[1]
    out_dtype = out_dtype if out_dtype is not None else x.dtype
    w = w.astype(jnp.bfloat16)
    b = b.astype(jnp.float32).reshape(1, N)

    tm = _pick_tile(M, tm_target, 8)
    tn = _pick_tile(N, tn_target, 128)
    tk = _pick_tile(K, tk_target, 128)
    nk = K // tk
    grid = (M // tm, N // tn, nk)

    if nk == 1:
        kern = _linear_kernel_direct
        scratch = []
    else:
        kern = _linear_kernel_acc
        scratch = [pltpu.VMEM((tm, tn), jnp.float32)]

    x_b = jnp.dtype(x.dtype).itemsize
    o_b = jnp.dtype(out_dtype).itemsize
    return pl.pallas_call(
        kern,
        out_shape=jax.ShapeDtypeStruct((M, N), out_dtype),
        grid=grid,
        in_specs=[pl.BlockSpec((tm, tk), lambda i, j, kk: (i, kk)),
                  pl.BlockSpec((tk, tn), lambda i, j, kk: (kk, j)),
                  pl.BlockSpec((1, tn), lambda i, j, kk: (0, j))],
        out_specs=pl.BlockSpec((tm, tn), lambda i, j, kk: (i, j)),
        scratch_shapes=scratch,
        compiler_params=pltpu.CompilerParams(
            dimension_semantics=("parallel", "parallel", "arbitrary"),
            vmem_limit_bytes=_vmem_limit_bytes()),
        cost_estimate=pl.CostEstimate(
            flops=2 * M * K * N,
            transcendentals=0,
            bytes_accessed=x_b * M * K * (N // tn)
                           + 2 * K * N * (M // tm) + o_b * M * N),
    )(x, w, b)


# ---------------------------------------------------------------------------
# Flash-style multi-head attention on [B, S, Hd] (heads split in-kernel).
# ---------------------------------------------------------------------------

def _mha_kernel(q_ref, k_ref, v_ref, o_ref, q_scr, m_scr, l_scr, acc_scr,
                *, num_heads, head_dim):
    kv = pl.program_id(2)
    tq = q_ref.shape[1]
    tk = k_ref.shape[1]

    @pl.when(kv == 0)
    def _():
        # Hoisted per-q-tile work: head split + 1/sqrt(D) scale done once,
        # reused across all kv steps (removes per-step XLU relayout + VPU mul).
        scale = head_dim ** -0.5
        q = q_ref[0].astype(jnp.float32) * scale
        q_scr[...] = q.reshape(tq, num_heads, head_dim).astype(jnp.bfloat16)
        m_scr[...] = jnp.full(m_scr.shape, -jnp.inf, jnp.float32)
        l_scr[...] = jnp.zeros(l_scr.shape, jnp.float32)
        acc_scr[...] = jnp.zeros(acc_scr.shape, jnp.float32)

    k = k_ref[0].reshape(tk, num_heads, head_dim).astype(jnp.bfloat16)
    v = v_ref[0].reshape(tk, num_heads, head_dim)

    # s[h, q, k] = sum_d q[q,h,d] * k[k,h,d]  (head = batch dim; bf16 MXU ops)
    s = jax.lax.dot_general(
        q_scr[...], k, dimension_numbers=(((2,), (2,)), ((1,), (1,))),
        preferred_element_type=jnp.float32)                    # [H, tq, tk]

    # keepdims reductions keep m/l in the same (H, tq, 1) layout as s/p rows.
    m_prev = m_scr[...]                                        # [H, tq, 1]
    m_new = jnp.maximum(m_prev, jnp.max(s, axis=-1, keepdims=True))
    alpha = jnp.exp(m_prev - m_new)                            # [H, tq, 1]
    p = jnp.exp(s - m_new)                                     # [H, tq, tk] f32
    l_scr[...] = alpha * l_scr[...] + jnp.sum(p, axis=-1, keepdims=True)

    # pv[h, q, d] = sum_k p[h,q,k] * v[k,h,d]; P cast to V dtype (bf16 MXU).
    # NOTE: for head_dim < 128 the [H,tq,D] acc uses only D/128 of the lanes;
    # packing 128/D heads per lane group would cut VPU rescale cost further.
    pv = jax.lax.dot_general(
        p.astype(v.dtype), v, dimension_numbers=(((2,), (0,)), ((0,), (1,))),
        preferred_element_type=jnp.float32)                    # [H, tq, D]
    acc_scr[...] = alpha * acc_scr[...] + pv
    m_scr[...] = m_new

    @pl.when(kv == pl.num_programs(2) - 1)
    def _():
        inv_l = pl.reciprocal(l_scr[...], approx=True)         # EUP, once/row
        out = acc_scr[...] * inv_l                             # [H, tq, D]
        # Epilogue-only head merge to a lane-dense [tq, Hd] output slab.
        out = jnp.transpose(out, (1, 0, 2)).reshape(tq, num_heads * head_dim)
        o_ref[0] = out.astype(o_ref.dtype)


def multihead_attention(q, k, v, *, num_heads, tq_target=256, tkv_target=512,
                        out_dtype=jnp.bfloat16):
    """q/k/v: [B, S, Hd] -> [B, S, Hd]; heads handled inside the kernel."""
    B, S, Hd = q.shape
    head_dim = Hd // num_heads
    tq = _pick_tile(S, tq_target, 8)
    tkv = _pick_tile(S, tkv_target, 8)
    grid = (B, S // tq, S // tkv)

    kern = functools.partial(_mha_kernel, num_heads=num_heads, head_dim=head_dim)
    q_spec = pl.BlockSpec((1, tq, Hd), lambda b, qi, kv: (b, qi, 0))
    kv_spec = pl.BlockSpec((1, tkv, Hd), lambda b, qi, kv: (b, kv, 0))
    o_spec = pl.BlockSpec((1, tq, Hd), lambda b, qi, kv: (b, qi, 0))

    in_b = jnp.dtype(q.dtype).itemsize
    o_b = jnp.dtype(out_dtype).itemsize
    n_qtiles = S // tq
    return pl.pallas_call(
        kern,
        out_shape=jax.ShapeDtypeStruct((B, S, Hd), out_dtype),
        grid=grid,
        in_specs=[q_spec, kv_spec, kv_spec],
        out_specs=o_spec,
        scratch_shapes=[pltpu.VMEM((tq, num_heads, head_dim), jnp.bfloat16),   # scaled q
                        pltpu.VMEM((num_heads, tq, 1), jnp.float32),           # m
                        pltpu.VMEM((num_heads, tq, 1), jnp.float32),           # l
                        pltpu.VMEM((num_heads, tq, head_dim), jnp.float32)],   # acc
        compiler_params=pltpu.CompilerParams(
            dimension_semantics=("parallel", "parallel", "arbitrary"),
            vmem_limit_bytes=_vmem_limit_bytes()),
        cost_estimate=pl.CostEstimate(
            flops=4 * B * S * S * Hd,
            transcendentals=B * num_heads * S * S,
            bytes_accessed=in_b * B * S * Hd * (1 + 2 * n_qtiles)
                           + o_b * B * S * Hd),
    )(q, k, v)


# ---------------------------------------------------------------------------
# SparseAttention forward (dense branch)
# ---------------------------------------------------------------------------

def sparse_attention_forward(hidden_states, params, num_heads):
    B, S, Hd = hidden_states.shape
    x2 = hidden_states.reshape(B * S, Hd)

    # Fused QKV projection: one concatenated [Hd, 3*Hd] bf16 weight, x read once.
    w_qkv = jnp.concatenate([params["wq"], params["wk"], params["wv"]], axis=1)
    b_qkv = jnp.concatenate([params["bq"], params["bk"], params["bv"]])
    q, k, v = qkv_projection(x2, w_qkv, b_qkv)                 # bf16 intermediates

    # [B*S, Hd] -> [B, S, Hd] is a layout-preserving reshape (no transpose).
    qh = q.reshape(B, S, Hd)
    kh = k.reshape(B, S, Hd)
    vh = v.reshape(B, S, Hd)

    attn = multihead_attention(qh, kh, vh, num_heads=num_heads)  # [B, S, Hd] bf16

    # Dropout is identity in eval mode.
    out = linear(attn.reshape(B * S, Hd), params["wo"], params["bo"],
                 out_dtype=hidden_states.dtype)
    return out.reshape(B, S, Hd)


# ---------------------------------------------------------------------------
# Reference (pure jnp) for sanity check
# ---------------------------------------------------------------------------

def reference_forward(hidden_states, params, num_heads):
    B, S, Hd = hidden_states.shape
    head_dim = Hd // num_heads
    q = hidden_states @ params["wq"] + params["bq"]
    k = hidden_states @ params["wk"] + params["bk"]
    v = hidden_states @ params["wv"] + params["bv"]

    def split(t):
        return t.reshape(B, S, num_heads, head_dim).transpose(0, 2, 1, 3)

    q, k, v = split(q), split(k), split(v)
    scores = jnp.einsum("bhqd,bhkd->bhqk", q, k) / jnp.sqrt(jnp.float32(head_dim))
    w = jax.nn.softmax(scores, axis=-1)
    o = jnp.einsum("bhqk,bhkd->bhqd", w, v)
    o = o.transpose(0, 2, 1, 3).reshape(B, S, Hd)
    return o @ params["wo"] + params["bo"]


# ---------------------------------------------------------------------------
# Main
# ---------------------------------------------------------------------------

if __name__ == "__main__":
    batch, seq, hidden, num_heads = 2, 8, 32, 4

    key = jax.random.PRNGKey(0)
    keys = jax.random.split(key, 9)
    init = lambda k, shape: (0.02 * jax.random.normal(k, shape)).astype(jnp.float32)

    params = {
        "wq": init(keys[0], (hidden, hidden)), "bq": init(keys[1], (hidden,)),
        "wk": init(keys[2], (hidden, hidden)), "bk": init(keys[3], (hidden,)),
        "wv": init(keys[4], (hidden, hidden)), "bv": init(keys[5], (hidden,)),
        "wo": init(keys[6], (hidden, hidden)), "bo": init(keys[7], (hidden,)),
    }
    hidden_states = jax.random.normal(keys[8], (batch, seq, hidden), dtype=jnp.float32)

    out = sparse_attention_forward(hidden_states, params, num_heads)
    out = jax.block_until_ready(out)

    ref = reference_forward(hidden_states, params, num_heads)
    assert out.shape == ref.shape, "shape mismatch vs reference"
    # bf16 MXU operands / bf16 intermediates => slightly looser tolerance than f32.
    assert jnp.allclose(out, ref, atol=2e-3, rtol=2e-3), "mismatch vs reference"

    print("KERNEL_OK")
</pallas_src>

<mosaic_0001>
module attributes {stable_mosaic.version = 11 : i64} {
  func.func @_qkv_proj_kernel_direct(%arg0: i32, %arg1: i32, %arg2: memref<16x32xf32, #tpu.memory_space<vmem>>, %arg3: memref<32x96xbf16, #tpu.memory_space<vmem>>, %arg4: memref<1x96xf32, #tpu.memory_space<vmem>>, %arg5: memref<16x32xbf16, #tpu.memory_space<vmem>>, %arg6: memref<16x32xbf16, #tpu.memory_space<vmem>>, %arg7: memref<16x32xbf16, #tpu.memory_space<vmem>>) attributes {dimension_semantics = [#tpu.dimension_semantics<parallel>, #tpu.dimension_semantics<arbitrary>], iteration_bounds = array<i64: 1, 1>, scalar_prefetch = 0 : i64, scratch_operands = 0 : i64, tpu.core_type = #tpu.core_type<tc>, window_params = [{transform_indices = @transform_0, window_bounds = array<i64: 16, 32>}, {transform_indices = @transform_1, window_bounds = array<i64: 32, 96>}, {pipeline_mode = #tpu.pipeline_mode<synchronous>, transform_indices = @transform_2, window_bounds = array<i64: 1, 96>}, {transform_indices = @transform_3, window_bounds = array<i64: 16, 32>}, {transform_indices = @transform_4, window_bounds = array<i64: 16, 32>}, {transform_indices = @transform_5, window_bounds = array<i64: 16, 32>}]} {
    %c0 = arith.constant 0 : index
    %c0_0 = arith.constant 0 : index
    %0 = vector.load %arg2[%c0, %c0_0] : memref<16x32xf32, #tpu.memory_space<vmem>>, vector<16x32xf32>
    %1 = arith.truncf %0 : vector<16x32xf32> to vector<16x32xbf16>
    %c0_1 = arith.constant 0 : index
    %c0_2 = arith.constant 0 : index
    %2 = vector.load %arg3[%c0_1, %c0_2] : memref<32x96xbf16, #tpu.memory_space<vmem>>, vector<32x96xbf16>
    %cst = arith.constant dense<0.000000e+00> : vector<16x96xf32>
    %3 = tpu.matmul %1, %2, %cst {dimension_numbers = #tpu.dot_dimension_numbers<[1], [0], [0], [1], [0, 0, 1, 1], [], []>} : vector<16x32xbf16>, vector<32x96xbf16>, vector<16x96xf32> -> vector<16x96xf32>
    %c0_3 = arith.constant 0 : index
    %c0_4 = arith.constant 0 : index
    %4 = vector.load %arg4[%c0_3, %c0_4] : memref<1x96xf32, #tpu.memory_space<vmem>>, vector<1x96xf32>
    %5 = vector.broadcast %4 : vector<1x96xf32> to vector<16x96xf32>
    %6 = arith.addf %3, %5 : vector<16x96xf32>
    %7 = vector.extract_strided_slice %6 {offsets = [0, 0], sizes = [16, 32], strides = [1, 1]} : vector<16x96xf32> to vector<16x32xf32>
    %8 = arith.truncf %7 : vector<16x32xf32> to vector<16x32xbf16>
    %c0_5 = arith.constant 0 : index
    %c0_6 = arith.constant 0 : index
    %9 = vector.load %arg5[%c0_5, %c0_6] : memref<16x32xbf16, #tpu.memory_space<vmem>>, vector<16x32xbf16>
    tpu.vector_store %arg5[%c0_5, %c0_6], %8 {strides = array<i32>} : memref<16x32xbf16, #tpu.memory_space<vmem>>, vector<16x32xbf16>,
    %10 = vector.extract_strided_slice %6 {offsets = [0, 32], sizes = [16, 32], strides = [1, 1]} : vector<16x96xf32> to vector<16x32xf32>
    %11 = arith.truncf %10 : vector<16x32xf32> to vector<16x32xbf16>
    %c0_7 = arith.constant 0 : index
    %c0_8 = arith.constant 0 : index
    %12 = vector.load %arg6[%c0_7, %c0_8] : memref<16x32xbf16, #tpu.memory_space<vmem>>, vector<16x32xbf16>
    tpu.vector_store %arg6[%c0_7, %c0_8], %11 {strides = array<i32>} : memref<16x32xbf16, #tpu.memory_space<vmem>>, vector<16x32xbf16>,
    %13 = vector.extract_strided_slice %6 {offsets = [0, 64], sizes = [16, 32], strides = [1, 1]} : vector<16x96xf32> to vector<16x32xf32>
    %14 = arith.truncf %13 : vector<16x32xf32> to vector<16x32xbf16>
    %c0_9 = arith.constant 0 : index
    %c0_10 = arith.constant 0 : index
    %15 = vector.load %arg7[%c0_9, %c0_10] : memref<16x32xbf16, #tpu.memory_space<vmem>>, vector<16x32xbf16>
    tpu.vector_store %arg7[%c0_9, %c0_10], %14 {strides = array<i32>} : memref<16x32xbf16, #tpu.memory_space<vmem>>, vector<16x32xbf16>,
    return
  }
  func.func @transform_0(%arg0: i32, %arg1: i32) -> (i32, i32) {
    %c0_i32 = arith.constant 0 : i32
    return %arg0, %arg1 : i32, i32
  }
  func.func @transform_1(%arg0: i32, %arg1: i32) -> (i32, i32) {
    %c0_i32 = arith.constant 0 : i32
    %c0_i32_0 = arith.constant 0 : i32
    return %arg1, %c0_i32 : i32, i32
  }
  func.func @transform_2(%arg0: i32, %arg1: i32) -> (i32, i32) {
    %c0_i32 = arith.constant 0 : i32
    %c0_i32_0 = arith.constant 0 : i32
    %c0_i32_1 = arith.constant 0 : i32
    return %c0_i32, %c0_i32_0 : i32, i32
  }
  func.func @transform_3(%arg0: i32, %arg1: i32) -> (i32, i32) {
    %c0_i32 = arith.constant 0 : i32
    %c0_i32_0 = arith.constant 0 : i32
    return %arg0, %c0_i32 : i32, i32
  }
  func.func @transform_4(%arg0: i32, %arg1: i32) -> (i32, i32) {
    %c0_i32 = arith.constant 0 : i32
    %c0_i32_0 = arith.constant 0 : i32
    return %arg0, %c0_i32 : i32, i32
  }
  func.func @transform_5(%arg0: i32, %arg1: i32) -> (i32, i32) {
    %c0_i32 = arith.constant 0 : i32
    %c0_i32_0 = arith.constant 0 : i32
    return %arg0, %c0_i32 : i32, i32
  }
}

</mosaic_0001>

<bundles_post_ra>
// kernel: tpu_custom_call.1
= control target key start
LH: loop header
LB: loop body
LE: loop exit
PB: predicated region body
PF: predicated region fallthrough
CT: control target
= control target key end

     0   :  { %11 = vsyncpa [#allocation3], 0  ;;  %s416_s0 = inlined_call_operand.hbm [shape: f32[16,32], index: 0, kind: input, shape index: {}]   ;;  %s417_s1 = inlined_call_operand.hbm [shape: bf16[32,96], index: 1, kind: input, shape index: {}]   ;;  %s418_s2 = inlined_call_operand.vmem [shape: f32[1,96], index: 2, kind: input, shape index: {}]   ;;  %s419_s3 = inlined_call_operand.hbm [shape: bf16[16,32], index: 3, kind: output, shape index: {0}]   ;;  %s420_s4 = inlined_call_operand.hbm [shape: bf16[16,32], index: 4, kind: output, shape index: {1}]   ;;  %s421_s5 = inlined_call_operand.hbm [shape: bf16[16,32], index: 5, kind: output, shape index: {2}]  }
   0x1   :  { %12 = vsyncpa [#allocation6], 0 }
   0x2   :  { %13 = vsyncpa [#allocation4], 0 }
   0x3   :  { %14 = vsyncpa [#allocation9], 0  ;;  %s336_s18 = smov [#allocation2]  }
   0x4   :  { %s20_s19 = sshll.u32 %s336_s18, 4  ;;  %s21_s19 = int_to_ptr.vmem [resolvable:$true] %s20_s19 }
   0x5   :  { %s236_s20 = scalar_lea.vmem %s21_s19, 256  ;;  %p241_p1 = scmp.lt.s32.totalorder %s21_s19, %s21_s19 }
   0x6   :  { %p237_p0 = scmp.ne.s32.totalorder %s21_s19, %s236_s20  ;;  %p242_p2 = scmp.lt.s32.totalorder %s236_s20, %s236_s20 }
   0x8   :  { %p243_p3 = por %p242_p2, %p241_p1 }
   0xa   :  { %p244_p4 = pnand %p243_p3, %p237_p0 }
   0xc   :  { %247 = shalt.err (!%p244_p4)
}
   0xd   :  { %s337_s21 = smov 128   ;;  %s338_s22 = smov 8  }
   0xe   :  { %26 = dma.hbm_to_vmem [thread:$0]  %s416_s0, 256, %s21_s19, [#allocation3], %s337_s21, %s337_s21, %s338_s22  }
   0xf   :  { %s339_s25 = smov [#allocation5]  }
  0x10   :  { %s32_s26 = sshll.u32 %s339_s25, 4  ;;  %s33_s26 = int_to_ptr.vmem [resolvable:$true] %s32_s26 }
  0x11   :  { %s256_s27 = scalar_lea.vmem %s33_s26, 256  ;;  %p261_p6 = scmp.lt.s32.totalorder %s33_s26, %s33_s26 }
  0x12   :  { %p257_p5 = scmp.ne.s32.totalorder %s33_s26, %s256_s27  ;;  %p262_p7 = scmp.lt.s32.totalorder %s256_s27, %s256_s27 }
  0x14   :  { %p263_p8 = por %p262_p7, %p261_p6 }
  0x16   :  { %p264_p9 = pnand %p263_p8, %p257_p5 }
  0x18   :  { %267 = shalt.err (!%p264_p9)
}
  0x19   :  { %s340_s28 = smov 64   ;;  %s341_s29 = smov 4  }
  0x1a   :  { %38 = dma.hbm_to_vmem [thread:$0]  %s417_s1, 256, %s33_s26, [#allocation6], %s340_s28, %s340_s28, %s341_s29  }
  0x1b   :  { %328 = dma.done.wait [#allocation3], 256  }
  0x1c   :  { %329 = vsyncadd [#allocation3], 4294967040 }
  0x1d   :  { %330 = dma.done.wait [#allocation6], 256  }
  0x1e   :  { %331 = vsyncadd [#allocation6], 4294967040  ;;  %v342_v0 = vmov 0.0   ;;  %vm343_vm0 = vmmov 0   ;;  %v226_v1 = vld [vmem:[#allocation5 + $0x8] sm:$0xff]   ;;  %v227_v2 = vld [vmem:[#allocation5] sm:$0xff]  }
  0x1f   :  { %206 = vmatprep.subr.bf16.mxu0 %v342_v0  ;;  %210 = vmatprep.mubr.msk.bf16.mxu0 %vm343_vm0, %v342_v0  ;;  %v48_v3 = vld [vmem:[#allocation2] sm:$0xff]  ;;  %v49_v4 = vld [vmem:[#allocation2 + $0x8] sm:$0xff]  ;;  %vm74_vm1 = vcmask 261120   ;;  %vm127_vm2 = vcmask 257024   ;;  %s344_s7 = smov [#allocation7]   ;;  %s345_s9 = smov 96  }
  0x20   :  { %207 = vmatpush3.bf16.msra.mxu0 %v226_v1  ;;  %v50_v5 = vpack.c.bf16 %v49_v4, %v48_v3  ;;  %v195_v6 = vld [vmem:[%s418_s2] ss:$0 sm:$0xff]  ;;  %s151_s8 = sshll.u32 %s344_s7, 4  ;;  %s152_s8 = int_to_ptr.vmem [resolvable:$true] %s151_s8 }
  0x21   :  { %208 = vmatprep.subr.bf16.mxu0 %v342_v0  ;;  %s268_s2 = scalar_lea.vmem %s152_s8, 128  ;;  %p273_p11 = scmp.lt.s32.totalorder %s152_s8, %s152_s8 }
  0x22   :  { %p269_p10 = scmp.ne.s32.totalorder %s152_s8, %s268_s2  ;;  %p274_p12 = scmp.lt.s32.totalorder %s268_s2, %s268_s2 }
  0x24   :  { %209 = vmatpush3.bf16.msra.mxu0 %v227_v2  ;;  %p275_p13 = por %p274_p12, %p273_p11 }
  0x26   :  { %p276_p0 = pnand %p275_p13, %p269_p10 }
  0x27   :  { %211 = vmatmul.mubr.msk.bf16.vlgmr.msra.gmra.mxu0 %vm74_vm1, %v50_v5 }
  0xe7   :  { %v112_v7 = vpop.f32.mrf.mxu0 }
  0xe8   :  { %v113_v8 = vadd.f32 %v195_v6, %v112_v7 }
  0xe9   :  { %v212_v9 = vpop.f32.mrf.mxu0 }
  0xea   :  { %v201_v10 = vpack.c.bf16 %v113_v8, %v113_v8 }
  0xeb   :  { %v115_v11 = vpop.f32.mrf.mxu0 }
  0xec   :  { %v116_v12 = vadd.f32 %v195_v6, %v115_v11  ;;  %138 = vrot.lane.b32.xlu1 %v201_v10, %s340_s28  ;;  %130 = vrot.lane.b32.xlu0 %v201_v10, %s345_s9  ;;  %128 = vst.msk [vmem:[#allocation7] sm:$0xf] %vm127_vm2, %v201_v10 }
  0xed   :  { %v213_v13 = vpop.f32.mrf.mxu0 }
  0xee   :  { %v202_v14 = vpack.c.bf16 %v116_v12, %v116_v12 }
  0xf0   :  { %140 = vrot.lane.b32.xlu1 %v202_v14, %s340_s28  ;;  %132 = vrot.lane.b32.xlu0 %v202_v14, %s345_s9  ;;  %129 = vst.msk [vmem:[#allocation7 + $0x4] sm:$0xf] %vm127_vm2, %v202_v14 }
  0xf1   :  { %279 = shalt.err (!%p276_p0)
}
  0xf2   :  { %157 = dma.vmem_to_hbm [thread:$0]  %s152_s8, 128, %s419_s3, [#allocation4], %s340_s28, %s340_s28, %s341_s29  }
  0xf3   :  { %s346_s12 = smov [#allocation8]   ;;  %s347_s14 = smov [#allocation10]  }
  0xf4   :  { %s163_s13 = sshll.u32 %s346_s12, 4  ;;  %s175_s15 = sshll.u32 %s347_s14, 4  ;;  %s164_s13 = int_to_ptr.vmem [resolvable:$true] %s163_s13  ;;  %s176_s15 = int_to_ptr.vmem [resolvable:$true] %s175_s15 }
  0xf5   :  { %s288_s16 = scalar_lea.vmem %s164_s13, 128  ;;  %p293_p2 = scmp.lt.s32.totalorder %s164_s13, %s164_s13 }
  0xf6   :  { %p289_p1 = scmp.ne.s32.totalorder %s164_s13, %s288_s16  ;;  %p294_p3 = scmp.lt.s32.totalorder %s288_s16, %s288_s16 }
  0xf8   :  { %p295_p4 = por %p294_p3, %p293_p2 }
  0xfa   :  { %p296_p5 = pnand %p295_p4, %p289_p1 }
 0x15e   :  { %v139_v15 = vpop.permute.xlu1 %138  ;;  %v131_v16 = vpop.permute.xlu0 %130 }
 0x15f   :  { %144 = vst.msk [vmem:[#allocation10] sm:$0xf] %vm127_vm2, %v139_v15  ;;  %136 = vst.msk [vmem:[#allocation8] sm:$0xf] %vm127_vm2, %v131_v16 }
 0x162   :  { %v141_v17 = vpop.permute.xlu1 %140  ;;  %v133_v18 = vpop.permute.xlu0 %132 }
 0x163   :  { %145 = vst.msk [vmem:[#allocation10 + $0x4] sm:$0xf] %vm127_vm2, %v141_v17  ;;  %137 = vst.msk [vmem:[#allocation8 + $0x4] sm:$0xf] %vm127_vm2, %v133_v18 }
 0x164   :  { %299 = shalt.err (!%p296_p5)
}
 0x165   :  { %169 = dma.vmem_to_hbm [thread:$0]  %s164_s13, 128, %s420_s4, [#allocation9], %s340_s28, %s340_s28, %s341_s29  }
 0x166   :  { %s308_s18 = scalar_lea.vmem %s176_s15, 128  ;;  %p313_p7 = scmp.lt.s32.totalorder %s176_s15, %s176_s15 }
 0x167   :  { %p309_p6 = scmp.ne.s32.totalorder %s176_s15, %s308_s18  ;;  %p314_p8 = scmp.lt.s32.totalorder %s308_s18, %s308_s18 }
 0x169   :  { %p315_p9 = por %p314_p8, %p313_p7 }
 0x16b   :  { %p316_p10 = pnand %p315_p9, %p309_p6 }
 0x16d   :  { %319 = shalt.err (!%p316_p10)
}
 0x16e   :  { %181 = dma.vmem_to_hbm [thread:$0]  %s176_s15, 128, %s421_s5, [#allocation9], %s340_s28, %s340_s28, %s341_s29  }
 0x16f   :  { %332 = dma.done.wait [#allocation4], 128  }
 0x170   :  { %333 = vsyncadd [#allocation4], 4294967168 }
 0x171   :  { %334 = dma.done.wait [#allocation9], 256  }
 0x172   :  { %335 = vsyncadd [#allocation9], 4294967040 }
 0x173   :  { %191 = vsyncpa [#allocation3], 1 }
 0x174   :  { %192 = vsyncpa [#allocation6], 1 }
 0x175   :  { %193 = vsyncpa [#allocation4], 1 }
 0x176   :  { %194 = vsyncpa [#allocation9], 1 }

</bundles_post_ra>
